<compile_context>
chip_gen: v5e
topology: v5e:2x2
jax: 0.10.0
libtpu: 0.0.40
codegen_flags: <defaults>
</compile_context>

<pallas_src>
import functools

import jax
import jax.numpy as jnp
from jax import lax
from jax.experimental import pallas as pl
from jax.experimental.pallas import tpu as pltpu

POOL_SIZES = (5, 9, 13)   # reference pyramid; kernel uses the cascaded-5x5 form
_LANE = 128


def _maxpool5_flat(p, wshift, hshift):
    """5x5 'same' max pool on a flat channels-major (C, HWp) map.

    wshift/hshift: [(fwd_add, bwd_add, flat_shift), ...] where fwd_add/bwd_add
    are (1, HWp) additive masks (0 where the shifted neighbor is in-image,
    -inf otherwise).  Separable: W pass (shifts 1, 2) then H pass (W, 2W).
    """
    hwp = p.shape[-1]
    m = p
    for fwd_add, bwd_add, s in wshift:
        fwd = pltpu.roll(p, hwp - s, axis=1) + fwd_add   # p[idx + s] or -inf
        bwd = pltpu.roll(p, s, axis=1) + bwd_add         # p[idx - s] or -inf
        m = jnp.maximum(m, jnp.maximum(fwd, bwd))
    r = m
    for fwd_add, bwd_add, s in hshift:
        fwd = pltpu.roll(m, hwp - s, axis=1) + fwd_add
        bwd = pltpu.roll(m, s, axis=1) + bwd_add
        r = jnp.maximum(r, jnp.maximum(fwd, bwd))
    return r


def _spp_kernel(x_ref, col_ref, row_ref, w1t_ref, b1_ref, w2t_ref, b2_ref,
                o_ref, *, H, W, mxu_dtype, pool_dtype):
    # x_ref:   (1, Cin, HWp)   channels-major input block (lane dim = padded H*W)
    # col_ref: (1, HWp) int32  w index per flat position (precomputed: no VPU div)
    # row_ref: (1, HWp) int32  h index per flat position
    # w1t_ref: (Cout, Cin)     cv1 weights, transposed, mxu_dtype
    # b1_ref:  (Cout, 1)       f32
    # w2t_ref: (4, Cout, Cout) cv2 weights, per-branch transposed, mxu_dtype
    # b2_ref:  (Cout, 1)       f32
    # o_ref:   (1, Cout, HWp)  channels-major output block (lane-dense)

    # Pool boundary masks, built ONCE per invocation and reused by all three
    # cascaded pools (additive 0 / -inf form; adds broadcast along sublanes).
    col = col_ref[...]
    row = row_ref[...]

    def edge(ok):
        return jnp.where(ok, 0.0, -jnp.inf).astype(pool_dtype)

    wshift = [(edge(col < W - s), edge(col >= s), s) for s in (1, 2) if s < W]
    hshift = [(edge(row < H - s), edge(row >= s), s * W) for s in (1, 2) if s < H]

    # cv1: 1x1 conv == channels-major matmul on the MXU (bf16 operands, f32 acc).
    x = x_ref[0].astype(mxu_dtype)                                 # (Cin, HWp)
    t = jnp.dot(w1t_ref[...], x, preferred_element_type=jnp.float32)
    t = t + b1_ref[...]                                            # (Cout, HWp) f32

    # cv2 identity branch first; remaining branches accumulate as the cascade
    # produces them, so only one pooled map is live at a time (no concat).
    acc = jnp.dot(w2t_ref[0], t.astype(mxu_dtype),
                  preferred_element_type=jnp.float32)              # (Cout, HWp)

    # SPPF cascade: pool5 applied 1/2/3 times == pools of 5/9/13 (max is
    # idempotent) -> identical to the reference pyramid at ~half the pool cost.
    p = t.astype(pool_dtype)
    for i in range(1, 4):
        p = _maxpool5_flat(p, wshift, hshift)
        acc = acc + jnp.dot(w2t_ref[i], p.astype(mxu_dtype),
                            preferred_element_type=jnp.float32)

    # Output is already channels-major and lane-dense: no final transpose.
    o_ref[0] = (acc + b2_ref[...]).astype(o_ref.dtype)


@functools.partial(jax.jit, static_argnames=("mxu_dtype", "pool_dtype"))
def spp_pallas(x_nchw, w1, b1, w2, b2, *, mxu_dtype=jnp.bfloat16,
               pool_dtype=jnp.float32):
    """SPP forward: (N, Cin, H, W) -> (N, Cout, H, W).

    w1:(Cin,Cout), b1:(Cout,)  == cv1 1x1 conv;  w2:(4*Cout,Cout), b2:(Cout,)
    == cv2 1x1 conv over the [x, pool5, pool9, pool13] channel concat.

    mxu_dtype: MXU operand dtype (bf16 default; accumulation always f32).
      Use jnp.float32 for a bit-exact f32 path.
    pool_dtype: dtype of the max-pool path.  Keep f32 on v5e (no bf16 VALU);
      bf16 is fine on v6e/v7x to halve VPU traffic.
    """
    N, Cin, H, W = x_nchw.shape
    Cout = w1.shape[1]
    HW = H * W
    HWp = ((HW + _LANE - 1) // _LANE) * _LANE        # lane-dense spatial dim

    # Free reshape + lane pad (padded tail never reaches valid outputs).
    x_flat = x_nchw.reshape(N, Cin, HW)
    if HWp != HW:
        x_flat = jnp.pad(x_flat, ((0, 0), (0, 0), (0, HWp - HW)))

    # Grid-invariant weights: pre-transpose to channels-major and pre-cast to
    # the MXU operand dtype in the wrapper (no per-branch casts in the kernel).
    w1t = w1.T.astype(mxu_dtype)                                       # (Cout, Cin)
    w2t = jnp.transpose(w2.reshape(4, Cout, Cout), (0, 2, 1)).astype(mxu_dtype)
    b1c = b1.reshape(Cout, 1).astype(jnp.float32)
    b2c = b2.reshape(Cout, 1).astype(jnp.float32)

    # Column/row index vectors for the pool boundary masks (VPU has no int
    # div/mod, so they are computed here; the kernel only does compares).
    sp = jnp.arange(HWp, dtype=jnp.int32)
    col_idx = (sp % W).reshape(1, HWp)
    row_idx = (sp // W).reshape(1, HWp)

    in_itemsize = jnp.dtype(x_nchw.dtype).itemsize
    mxu_itemsize = jnp.dtype(mxu_dtype).itemsize

    # VMEM budget from the actual footprint (double-buffered I/O blocks +
    # weights + live intermediates), with headroom; stays below v7x's 64 MiB.
    est = int(1.5 * (2 * (Cin + Cout) * HWp * in_itemsize
                     + 2 * ((Cin * Cout + 4 * Cout * Cout) * mxu_itemsize
                            + 2 * Cout * 4 + 2 * HWp * 4)
                     + 8 * Cout * HWp * 4))
    vmem_limit = max(32 * 1024 * 1024, est)

    flops = 2 * N * HWp * Cout * (Cin + 4 * Cout)
    bytes_accessed = (N * (Cin + Cout) * HWp * in_itemsize
                      + (Cin * Cout + 4 * Cout * Cout) * mxu_itemsize
                      + 2 * Cout * 4 + 2 * HWp * 4)
    cost = pl.CostEstimate(flops=flops, transcendentals=0,
                           bytes_accessed=int(bytes_accessed))

    kernel = functools.partial(_spp_kernel, H=H, W=W,
                               mxu_dtype=mxu_dtype, pool_dtype=pool_dtype)

    # TODO(synk): for feature maps far larger than YOLO SPP sizes, or N==1 on
    # v7x's two TensorCores, add a parallel H-tile grid axis with a 6-row halo
    # (manual make_async_copy) so a block is a strip of rows, not a whole image.
    # TODO(synk): mark the constant-index weight inputs pipeline_mode=
    # pl.Buffered(1) once single-buffering of invariant blocks is verified on
    # the target jax version (the pipeline already skips re-copying them).
    out_flat = pl.pallas_call(
        kernel,
        out_shape=jax.ShapeDtypeStruct((N, Cout, HWp), x_nchw.dtype),
        grid_spec=pltpu.PrefetchScalarGridSpec(
            num_scalar_prefetch=0,
            grid=(N,),
            in_specs=[
                pl.BlockSpec((1, Cin, HWp), lambda n: (n, 0, 0)),     # x
                pl.BlockSpec((1, HWp), lambda n: (0, 0)),             # col idx
                pl.BlockSpec((1, HWp), lambda n: (0, 0)),             # row idx
                pl.BlockSpec((Cout, Cin), lambda n: (0, 0)),          # w1^T
                pl.BlockSpec((Cout, 1), lambda n: (0, 0)),            # b1
                pl.BlockSpec((4, Cout, Cout), lambda n: (0, 0, 0)),   # w2^T stack
                pl.BlockSpec((Cout, 1), lambda n: (0, 0)),            # b2
            ],
            out_specs=pl.BlockSpec((1, Cout, HWp), lambda n: (n, 0, 0)),
        ),
        compiler_params=pltpu.CompilerParams(
            dimension_semantics=("parallel",),
            vmem_limit_bytes=vmem_limit,
        ),
        cost_estimate=cost,
    )(x_flat, col_idx, row_idx, w1t, b1c, w2t, b2c)

    return out_flat[:, :, :HW].reshape(N, Cout, H, W)


def spp_reference(x_nchw, w1, b1, w2, b2):
    """Pure-JAX reference matching PyTorch SPP.forward semantics."""
    x_nhwc = jnp.transpose(x_nchw, (0, 2, 3, 1))
    t = jnp.einsum('nhwc,cd->nhwd', x_nhwc, w1) + b1      # cv1
    feats = [t]
    for k in POOL_SIZES:
        p = k // 2
        pooled = lax.reduce_window(
            t, -jnp.inf, lax.max,
            window_dimensions=(1, k, k, 1),
            window_strides=(1, 1, 1, 1),
            padding=((0, 0), (p, p), (p, p), (0, 0)))
        feats.append(pooled)
    cat = jnp.concatenate(feats, axis=-1)                 # channel concat
    out = jnp.einsum('nhwc,cd->nhwd', cat, w2) + b2       # cv2
    return jnp.transpose(out, (0, 3, 1, 2))


if __name__ == "__main__":
    N, Cin, Cout, H, W = 2, 4, 8, 16, 16

    key = jax.random.PRNGKey(0)
    kx, kw1, kb1, kw2, kb2 = jax.random.split(key, 5)

    # PyTorch cv1.weight is (Cout, Cin, 1, 1); we store the equivalent matmul
    # weights directly: w1:(Cin, Cout), w2:(4*Cout, Cout).
    x = jax.random.normal(kx, (N, Cin, H, W), dtype=jnp.float32)
    w1 = jax.random.normal(kw1, (Cin, Cout), dtype=jnp.float32) * 0.1
    b1 = jax.random.normal(kb1, (Cout,), dtype=jnp.float32) * 0.1
    w2 = jax.random.normal(kw2, (4 * Cout, Cout), dtype=jnp.float32) * 0.1
    b2 = jax.random.normal(kb2, (Cout,), dtype=jnp.float32) * 0.1

    ref = spp_reference(x, w1, b1, w2, b2)

    # Exact f32 MXU path: structural correctness check against the reference.
    out_f32 = jax.block_until_ready(
        spp_pallas(x, w1, b1, w2, b2, mxu_dtype=jnp.float32))
    assert out_f32.shape == (N, Cout, H, W), out_f32.shape
    err_f32 = float(jnp.max(jnp.abs(out_f32 - ref)))
    assert jnp.allclose(out_f32, ref, atol=2e-4, rtol=2e-4), err_f32

    # Default fast path: bf16 MXU operands, f32 accumulation + f32 pooling
    # (tolerance relaxed for bf16 operand rounding, per review).
    out = jax.block_until_ready(spp_pallas(x, w1, b1, w2, b2))
    assert out.shape == (N, Cout, H, W), out.shape
    err_bf16 = float(jnp.max(jnp.abs(out - ref)))
    assert jnp.allclose(out, ref, atol=3e-2, rtol=3e-2), err_bf16

    print("KERNEL_OK")
</pallas_src>

<mosaic_0001>
module attributes {stable_mosaic.version = 11 : i64} {
  func.func @_spp_kernel(%arg0: i32, %arg1: memref<1x4x256xf32, #tpu.memory_space<vmem>>, %arg2: memref<1x256xi32, #tpu.memory_space<vmem>>, %arg3: memref<1x256xi32, #tpu.memory_space<vmem>>, %arg4: memref<8x4xf32, #tpu.memory_space<vmem>>, %arg5: memref<8x1xf32, #tpu.memory_space<vmem>>, %arg6: memref<4x8x8xf32, #tpu.memory_space<vmem>>, %arg7: memref<8x1xf32, #tpu.memory_space<vmem>>, %arg8: memref<1x8x256xf32, #tpu.memory_space<vmem>>) attributes {dimension_semantics = [#tpu.dimension_semantics<parallel>], iteration_bounds = array<i64: 2>, scalar_prefetch = 0 : i64, scratch_operands = 0 : i64, tpu.core_type = #tpu.core_type<tc>, window_params = [{transform_indices = @transform_0, window_bounds = array<i64: 1, 4, 256>}, {pipeline_mode = #tpu.pipeline_mode<synchronous>, transform_indices = @transform_1, window_bounds = array<i64: 1, 256>}, {pipeline_mode = #tpu.pipeline_mode<synchronous>, transform_indices = @transform_2, window_bounds = array<i64: 1, 256>}, {pipeline_mode = #tpu.pipeline_mode<synchronous>, transform_indices = @transform_3, window_bounds = array<i64: 8, 4>}, {pipeline_mode = #tpu.pipeline_mode<synchronous>, transform_indices = @transform_4, window_bounds = array<i64: 8, 1>}, {pipeline_mode = #tpu.pipeline_mode<synchronous>, transform_indices = @transform_5, window_bounds = array<i64: 4, 8, 8>}, {pipeline_mode = #tpu.pipeline_mode<synchronous>, transform_indices = @transform_6, window_bounds = array<i64: 8, 1>}, {transform_indices = @transform_7, window_bounds = array<i64: 1, 8, 256>}]} {
    %c0 = arith.constant 0 : index
    %c0_0 = arith.constant 0 : index
    %0 = vector.load %arg2[%c0, %c0_0] : memref<1x256xi32, #tpu.memory_space<vmem>>, vector<1x256xi32>
    %c0_1 = arith.constant 0 : index
    %c0_2 = arith.constant 0 : index
    %1 = vector.load %arg3[%c0_1, %c0_2] : memref<1x256xi32, #tpu.memory_space<vmem>>, vector<1x256xi32>
    %c15_i32 = arith.constant 15 : i32
    %2 = vector.broadcast %c15_i32 : i32 to vector<1x256xi32>
    %3 = arith.cmpi slt, %0, %2 : vector<1x256xi32>
    %cst = arith.constant 0.000000e+00 : f32
    %cst_3 = arith.constant 0xFF800000 : f32
    %4 = vector.broadcast %cst : f32 to vector<1x256xf32>
    %5 = vector.broadcast %cst_3 : f32 to vector<1x256xf32>
    %6 = arith.select %3, %4, %5 : vector<1x256xi1>, vector<1x256xf32>
    %c1_i32 = arith.constant 1 : i32
    %7 = vector.broadcast %c1_i32 : i32 to vector<1x256xi32>
    %8 = arith.cmpi sge, %0, %7 : vector<1x256xi32>
    %cst_4 = arith.constant 0.000000e+00 : f32
    %cst_5 = arith.constant 0xFF800000 : f32
    %9 = vector.broadcast %cst_4 : f32 to vector<1x256xf32>
    %10 = vector.broadcast %cst_5 : f32 to vector<1x256xf32>
    %11 = arith.select %8, %9, %10 : vector<1x256xi1>, vector<1x256xf32>
    %c14_i32 = arith.constant 14 : i32
    %12 = vector.broadcast %c14_i32 : i32 to vector<1x256xi32>
    %13 = arith.cmpi slt, %0, %12 : vector<1x256xi32>
    %cst_6 = arith.constant 0.000000e+00 : f32
    %cst_7 = arith.constant 0xFF800000 : f32
    %14 = vector.broadcast %cst_6 : f32 to vector<1x256xf32>
    %15 = vector.broadcast %cst_7 : f32 to vector<1x256xf32>
    %16 = arith.select %13, %14, %15 : vector<1x256xi1>, vector<1x256xf32>
    %c2_i32 = arith.constant 2 : i32
    %17 = vector.broadcast %c2_i32 : i32 to vector<1x256xi32>
    %18 = arith.cmpi sge, %0, %17 : vector<1x256xi32>
    %cst_8 = arith.constant 0.000000e+00 : f32
    %cst_9 = arith.constant 0xFF800000 : f32
    %19 = vector.broadcast %cst_8 : f32 to vector<1x256xf32>
    %20 = vector.broadcast %cst_9 : f32 to vector<1x256xf32>
    %21 = arith.select %18, %19, %20 : vector<1x256xi1>, vector<1x256xf32>
    %c15_i32_10 = arith.constant 15 : i32
    %22 = vector.broadcast %c15_i32_10 : i32 to vector<1x256xi32>
    %23 = arith.cmpi slt, %1, %22 : vector<1x256xi32>
    %cst_11 = arith.constant 0.000000e+00 : f32
    %cst_12 = arith.constant 0xFF800000 : f32
    %24 = vector.broadcast %cst_11 : f32 to vector<1x256xf32>
    %25 = vector.broadcast %cst_12 : f32 to vector<1x256xf32>
    %26 = arith.select %23, %24, %25 : vector<1x256xi1>, vector<1x256xf32>
    %c1_i32_13 = arith.constant 1 : i32
    %27 = vector.broadcast %c1_i32_13 : i32 to vector<1x256xi32>
    %28 = arith.cmpi sge, %1, %27 : vector<1x256xi32>
    %cst_14 = arith.constant 0.000000e+00 : f32
    %cst_15 = arith.constant 0xFF800000 : f32
    %29 = vector.broadcast %cst_14 : f32 to vector<1x256xf32>
    %30 = vector.broadcast %cst_15 : f32 to vector<1x256xf32>
    %31 = arith.select %28, %29, %30 : vector<1x256xi1>, vector<1x256xf32>
    %c14_i32_16 = arith.constant 14 : i32
    %32 = vector.broadcast %c14_i32_16 : i32 to vector<1x256xi32>
    %33 = arith.cmpi slt, %1, %32 : vector<1x256xi32>
    %cst_17 = arith.constant 0.000000e+00 : f32
    %cst_18 = arith.constant 0xFF800000 : f32
    %34 = vector.broadcast %cst_17 : f32 to vector<1x256xf32>
    %35 = vector.broadcast %cst_18 : f32 to vector<1x256xf32>
    %36 = arith.select %33, %34, %35 : vector<1x256xi1>, vector<1x256xf32>
    %c2_i32_19 = arith.constant 2 : i32
    %37 = vector.broadcast %c2_i32_19 : i32 to vector<1x256xi32>
    %38 = arith.cmpi sge, %1, %37 : vector<1x256xi32>
    %cst_20 = arith.constant 0.000000e+00 : f32
    %cst_21 = arith.constant 0xFF800000 : f32
    %39 = vector.broadcast %cst_20 : f32 to vector<1x256xf32>
    %40 = vector.broadcast %cst_21 : f32 to vector<1x256xf32>
    %41 = arith.select %38, %39, %40 : vector<1x256xi1>, vector<1x256xf32>
    %c0_22 = arith.constant 0 : index
    %c0_23 = arith.constant 0 : index
    %c0_24 = arith.constant 0 : index
    %42 = vector.load %arg1[%c0_22, %c0_23, %c0_24] : memref<1x4x256xf32, #tpu.memory_space<vmem>>, vector<1x4x256xf32>
    %43 = vector.shape_cast %42 : vector<1x4x256xf32> to vector<4x256xf32>
    %c0_25 = arith.constant 0 : index
    %c0_26 = arith.constant 0 : index
    %44 = vector.load %arg4[%c0_25, %c0_26] : memref<8x4xf32, #tpu.memory_space<vmem>>, vector<8x4xf32>
    %cst_27 = arith.constant dense<0.000000e+00> : vector<8x256xf32>
    %45 = tpu.matmul %44, %43, %cst_27 {dimension_numbers = #tpu.dot_dimension_numbers<[1], [0], [0], [1], [0, 0, 1, 1], [], []>} : vector<8x4xf32>, vector<4x256xf32>, vector<8x256xf32> -> vector<8x256xf32>
    %c0_28 = arith.constant 0 : index
    %c0_29 = arith.constant 0 : index
    %46 = vector.load %arg5[%c0_28, %c0_29] : memref<8x1xf32, #tpu.memory_space<vmem>>, vector<8x1xf32>
    %47 = vector.broadcast %46 : vector<8x1xf32> to vector<8x256xf32>
    %48 = arith.addf %45, %47 : vector<8x256xf32>
    %c0_30 = arith.constant 0 : index
    %c0_31 = arith.constant 0 : index
    %c0_32 = arith.constant 0 : index
    %49 = vector.load %arg6[%c0_30, %c0_31, %c0_32] : memref<4x8x8xf32, #tpu.memory_space<vmem>>, vector<1x8x8xf32>
    %50 = vector.shape_cast %49 : vector<1x8x8xf32> to vector<8x8xf32>
    %cst_33 = arith.constant dense<0.000000e+00> : vector<8x256xf32>
    %51 = tpu.matmul %50, %48, %cst_33 {dimension_numbers = #tpu.dot_dimension_numbers<[1], [0], [0], [1], [0, 0, 1, 1], [], []>} : vector<8x8xf32>, vector<8x256xf32>, vector<8x256xf32> -> vector<8x256xf32>
    %c255_i32 = arith.constant 255 : i32
    %52 = tpu.dynamic_rotate %48 by %c255_i32 dim 1 : vector<8x256xf32>, i32 -> vector<8x256xf32>
    %53 = vector.broadcast %6 : vector<1x256xf32> to vector<8x256xf32>
    %54 = arith.addf %52, %53 : vector<8x256xf32>
    %c1_i32_34 = arith.constant 1 : i32
    %55 = tpu.dynamic_rotate %48 by %c1_i32_34 dim 1 : vector<8x256xf32>, i32 -> vector<8x256xf32>
    %56 = vector.broadcast %11 : vector<1x256xf32> to vector<8x256xf32>
    %57 = arith.addf %55, %56 : vector<8x256xf32>
    %58 = arith.maximumf %54, %57 : vector<8x256xf32>
    %59 = arith.maximumf %48, %58 : vector<8x256xf32>
    %c254_i32 = arith.constant 254 : i32
    %60 = tpu.dynamic_rotate %48 by %c254_i32 dim 1 : vector<8x256xf32>, i32 -> vector<8x256xf32>
    %61 = vector.broadcast %16 : vector<1x256xf32> to vector<8x256xf32>
    %62 = arith.addf %60, %61 : vector<8x256xf32>
    %c2_i32_35 = arith.constant 2 : i32
    %63 = tpu.dynamic_rotate %48 by %c2_i32_35 dim 1 : vector<8x256xf32>, i32 -> vector<8x256xf32>
    %64 = vector.broadcast %21 : vector<1x256xf32> to vector<8x256xf32>
    %65 = arith.addf %63, %64 : vector<8x256xf32>
    %66 = arith.maximumf %62, %65 : vector<8x256xf32>
    %67 = arith.maximumf %59, %66 : vector<8x256xf32>
    %c240_i32 = arith.constant 240 : i32
    %68 = tpu.dynamic_rotate %67 by %c240_i32 dim 1 : vector<8x256xf32>, i32 -> vector<8x256xf32>
    %69 = vector.broadcast %26 : vector<1x256xf32> to vector<8x256xf32>
    %70 = arith.addf %68, %69 : vector<8x256xf32>
    %c16_i32 = arith.constant 16 : i32
    %71 = tpu.dynamic_rotate %67 by %c16_i32 dim 1 : vector<8x256xf32>, i32 -> vector<8x256xf32>
    %72 = vector.broadcast %31 : vector<1x256xf32> to vector<8x256xf32>
    %73 = arith.addf %71, %72 : vector<8x256xf32>
    %74 = arith.maximumf %70, %73 : vector<8x256xf32>
    %75 = arith.maximumf %67, %74 : vector<8x256xf32>
    %c224_i32 = arith.constant 224 : i32
    %76 = tpu.dynamic_rotate %67 by %c224_i32 dim 1 : vector<8x256xf32>, i32 -> vector<8x256xf32>
    %77 = vector.broadcast %36 : vector<1x256xf32> to vector<8x256xf32>
    %78 = arith.addf %76, %77 : vector<8x256xf32>
    %c32_i32 = arith.constant 32 : i32
    %79 = tpu.dynamic_rotate %67 by %c32_i32 dim 1 : vector<8x256xf32>, i32 -> vector<8x256xf32>
    %80 = vector.broadcast %41 : vector<1x256xf32> to vector<8x256xf32>
    %81 = arith.addf %79, %80 : vector<8x256xf32>
    %82 = arith.maximumf %78, %81 : vector<8x256xf32>
    %83 = arith.maximumf %75, %82 : vector<8x256xf32>
    %c1 = arith.constant 1 : index
    %c0_36 = arith.constant 0 : index
    %c0_37 = arith.constant 0 : index
    %84 = vector.load %arg6[%c1, %c0_36, %c0_37] : memref<4x8x8xf32, #tpu.memory_space<vmem>>, vector<1x8x8xf32>
    %85 = vector.shape_cast %84 : vector<1x8x8xf32> to vector<8x8xf32>
    %cst_38 = arith.constant dense<0.000000e+00> : vector<8x256xf32>
    %86 = tpu.matmul %85, %83, %cst_38 {dimension_numbers = #tpu.dot_dimension_numbers<[1], [0], [0], [1], [0, 0, 1, 1], [], []>} : vector<8x8xf32>, vector<8x256xf32>, vector<8x256xf32> -> vector<8x256xf32>
    %87 = arith.addf %51, %86 : vector<8x256xf32>
    %c255_i32_39 = arith.constant 255 : i32
    %88 = tpu.dynamic_rotate %83 by %c255_i32_39 dim 1 : vector<8x256xf32>, i32 -> vector<8x256xf32>
    %89 = vector.broadcast %6 : vector<1x256xf32> to vector<8x256xf32>
    %90 = arith.addf %88, %89 : vector<8x256xf32>
    %c1_i32_40 = arith.constant 1 : i32
    %91 = tpu.dynamic_rotate %83 by %c1_i32_40 dim 1 : vector<8x256xf32>, i32 -> vector<8x256xf32>
    %92 = vector.broadcast %11 : vector<1x256xf32> to vector<8x256xf32>
    %93 = arith.addf %91, %92 : vector<8x256xf32>
    %94 = arith.maximumf %90, %93 : vector<8x256xf32>
    %95 = arith.maximumf %83, %94 : vector<8x256xf32>
    %c254_i32_41 = arith.constant 254 : i32
    %96 = tpu.dynamic_rotate %83 by %c254_i32_41 dim 1 : vector<8x256xf32>, i32 -> vector<8x256xf32>
    %97 = vector.broadcast %16 : vector<1x256xf32> to vector<8x256xf32>
    %98 = arith.addf %96, %97 : vector<8x256xf32>
    %c2_i32_42 = arith.constant 2 : i32
    %99 = tpu.dynamic_rotate %83 by %c2_i32_42 dim 1 : vector<8x256xf32>, i32 -> vector<8x256xf32>
    %100 = vector.broadcast %21 : vector<1x256xf32> to vector<8x256xf32>
    %101 = arith.addf %99, %100 : vector<8x256xf32>
    %102 = arith.maximumf %98, %101 : vector<8x256xf32>
    %103 = arith.maximumf %95, %102 : vector<8x256xf32>
    %c240_i32_43 = arith.constant 240 : i32
    %104 = tpu.dynamic_rotate %103 by %c240_i32_43 dim 1 : vector<8x256xf32>, i32 -> vector<8x256xf32>
    %105 = vector.broadcast %26 : vector<1x256xf32> to vector<8x256xf32>
    %106 = arith.addf %104, %105 : vector<8x256xf32>
    %c16_i32_44 = arith.constant 16 : i32
    %107 = tpu.dynamic_rotate %103 by %c16_i32_44 dim 1 : vector<8x256xf32>, i32 -> vector<8x256xf32>
    %108 = vector.broadcast %31 : vector<1x256xf32> to vector<8x256xf32>
    %109 = arith.addf %107, %108 : vector<8x256xf32>
    %110 = arith.maximumf %106, %109 : vector<8x256xf32>
    %111 = arith.maximumf %103, %110 : vector<8x256xf32>
    %c224_i32_45 = arith.constant 224 : i32
    %112 = tpu.dynamic_rotate %103 by %c224_i32_45 dim 1 : vector<8x256xf32>, i32 -> vector<8x256xf32>
    %113 = vector.broadcast %36 : vector<1x256xf32> to vector<8x256xf32>
    %114 = arith.addf %112, %113 : vector<8x256xf32>
    %c32_i32_46 = arith.constant 32 : i32
    %115 = tpu.dynamic_rotate %103 by %c32_i32_46 dim 1 : vector<8x256xf32>, i32 -> vector<8x256xf32>
    %116 = vector.broadcast %41 : vector<1x256xf32> to vector<8x256xf32>
    %117 = arith.addf %115, %116 : vector<8x256xf32>
    %118 = arith.maximumf %114, %117 : vector<8x256xf32>
    %119 = arith.maximumf %111, %118 : vector<8x256xf32>
    %c2 = arith.constant 2 : index
    %c0_47 = arith.constant 0 : index
    %c0_48 = arith.constant 0 : index
    %120 = vector.load %arg6[%c2, %c0_47, %c0_48] : memref<4x8x8xf32, #tpu.memory_space<vmem>>, vector<1x8x8xf32>
    %121 = vector.shape_cast %120 : vector<1x8x8xf32> to vector<8x8xf32>
    %cst_49 = arith.constant dense<0.000000e+00> : vector<8x256xf32>
    %122 = tpu.matmul %121, %119, %cst_49 {dimension_numbers = #tpu.dot_dimension_numbers<[1], [0], [0], [1], [0, 0, 1, 1], [], []>} : vector<8x8xf32>, vector<8x256xf32>, vector<8x256xf32> -> vector<8x256xf32>
    %123 = arith.addf %87, %122 : vector<8x256xf32>
    %c255_i32_50 = arith.constant 255 : i32
    %124 = tpu.dynamic_rotate %119 by %c255_i32_50 dim 1 : vector<8x256xf32>, i32 -> vector<8x256xf32>
    %125 = vector.broadcast %6 : vector<1x256xf32> to vector<8x256xf32>
    %126 = arith.addf %124, %125 : vector<8x256xf32>
    %c1_i32_51 = arith.constant 1 : i32
    %127 = tpu.dynamic_rotate %119 by %c1_i32_51 dim 1 : vector<8x256xf32>, i32 -> vector<8x256xf32>
    %128 = vector.broadcast %11 : vector<1x256xf32> to vector<8x256xf32>
    %129 = arith.addf %127, %128 : vector<8x256xf32>
    %130 = arith.maximumf %126, %129 : vector<8x256xf32>
    %131 = arith.maximumf %119, %130 : vector<8x256xf32>
    %c254_i32_52 = arith.constant 254 : i32
    %132 = tpu.dynamic_rotate %119 by %c254_i32_52 dim 1 : vector<8x256xf32>, i32 -> vector<8x256xf32>
    %133 = vector.broadcast %16 : vector<1x256xf32> to vector<8x256xf32>
    %134 = arith.addf %132, %133 : vector<8x256xf32>
    %c2_i32_53 = arith.constant 2 : i32
    %135 = tpu.dynamic_rotate %119 by %c2_i32_53 dim 1 : vector<8x256xf32>, i32 -> vector<8x256xf32>
    %136 = vector.broadcast %21 : vector<1x256xf32> to vector<8x256xf32>
    %137 = arith.addf %135, %136 : vector<8x256xf32>
    %138 = arith.maximumf %134, %137 : vector<8x256xf32>
    %139 = arith.maximumf %131, %138 : vector<8x256xf32>
    %c240_i32_54 = arith.constant 240 : i32
    %140 = tpu.dynamic_rotate %139 by %c240_i32_54 dim 1 : vector<8x256xf32>, i32 -> vector<8x256xf32>
    %141 = vector.broadcast %26 : vector<1x256xf32> to vector<8x256xf32>
    %142 = arith.addf %140, %141 : vector<8x256xf32>
    %c16_i32_55 = arith.constant 16 : i32
    %143 = tpu.dynamic_rotate %139 by %c16_i32_55 dim 1 : vector<8x256xf32>, i32 -> vector<8x256xf32>
    %144 = vector.broadcast %31 : vector<1x256xf32> to vector<8x256xf32>
    %145 = arith.addf %143, %144 : vector<8x256xf32>
    %146 = arith.maximumf %142, %145 : vector<8x256xf32>
    %147 = arith.maximumf %139, %146 : vector<8x256xf32>
    %c224_i32_56 = arith.constant 224 : i32
    %148 = tpu.dynamic_rotate %139 by %c224_i32_56 dim 1 : vector<8x256xf32>, i32 -> vector<8x256xf32>
    %149 = vector.broadcast %36 : vector<1x256xf32> to vector<8x256xf32>
    %150 = arith.addf %148, %149 : vector<8x256xf32>
    %c32_i32_57 = arith.constant 32 : i32
    %151 = tpu.dynamic_rotate %139 by %c32_i32_57 dim 1 : vector<8x256xf32>, i32 -> vector<8x256xf32>
    %152 = vector.broadcast %41 : vector<1x256xf32> to vector<8x256xf32>
    %153 = arith.addf %151, %152 : vector<8x256xf32>
    %154 = arith.maximumf %150, %153 : vector<8x256xf32>
    %155 = arith.maximumf %147, %154 : vector<8x256xf32>
    %c3 = arith.constant 3 : index
    %c0_58 = arith.constant 0 : index
    %c0_59 = arith.constant 0 : index
    %156 = vector.load %arg6[%c3, %c0_58, %c0_59] : memref<4x8x8xf32, #tpu.memory_space<vmem>>, vector<1x8x8xf32>
    %157 = vector.shape_cast %156 : vector<1x8x8xf32> to vector<8x8xf32>
    %cst_60 = arith.constant dense<0.000000e+00> : vector<8x256xf32>
    %158 = tpu.matmul %157, %155, %cst_60 {dimension_numbers = #tpu.dot_dimension_numbers<[1], [0], [0], [1], [0, 0, 1, 1], [], []>} : vector<8x8xf32>, vector<8x256xf32>, vector<8x256xf32> -> vector<8x256xf32>
    %159 = arith.addf %123, %158 : vector<8x256xf32>
    %c0_61 = arith.constant 0 : index
    %c0_62 = arith.constant 0 : index
    %160 = vector.load %arg7[%c0_61, %c0_62] : memref<8x1xf32, #tpu.memory_space<vmem>>, vector<8x1xf32>
    %161 = vector.broadcast %160 : vector<8x1xf32> to vector<8x256xf32>
    %162 = arith.addf %159, %161 : vector<8x256xf32>
    %c0_63 = arith.constant 0 : index
    %c0_64 = arith.constant 0 : index
    %c0_65 = arith.constant 0 : index
    %163 = vector.load %arg8[%c0_63, %c0_64, %c0_65] : memref<1x8x256xf32, #tpu.memory_space<vmem>>, vector<1x8x256xf32>
    %164 = vector.shape_cast %163 : vector<1x8x256xf32> to vector<8x256xf32>
    %165 = vector.shape_cast %162 : vector<8x256xf32> to vector<1x8x256xf32>
    tpu.vector_store %arg8[%c0_63, %c0_64, %c0_65], %165 {strides = array<i32>} : memref<1x8x256xf32, #tpu.memory_space<vmem>>, vector<1x8x256xf32>,
    return
  }
  func.func @transform_0(%arg0: i32) -> (i32, i32, i32) {
    %c0_i32 = arith.constant 0 : i32
    %c0_i32_0 = arith.constant 0 : i32
    %c0_i32_1 = arith.constant 0 : i32
    return %arg0, %c0_i32, %c0_i32_0 : i32, i32, i32
  }
  func.func @transform_1(%arg0: i32) -> (i32, i32) {
    %c0_i32 = arith.constant 0 : i32
    %c0_i32_0 = arith.constant 0 : i32
    %c0_i32_1 = arith.constant 0 : i32
    return %c0_i32, %c0_i32_0 : i32, i32
  }
  func.func @transform_2(%arg0: i32) -> (i32, i32) {
    %c0_i32 = arith.constant 0 : i32
    %c0_i32_0 = arith.constant 0 : i32
    %c0_i32_1 = arith.constant 0 : i32
    return %c0_i32, %c0_i32_0 : i32, i32
  }
  func.func @transform_3(%arg0: i32) -> (i32, i32) {
    %c0_i32 = arith.constant 0 : i32
    %c0_i32_0 = arith.constant 0 : i32
    %c0_i32_1 = arith.constant 0 : i32
    return %c0_i32, %c0_i32_0 : i32, i32
  }
  func.func @transform_4(%arg0: i32) -> (i32, i32) {
    %c0_i32 = arith.constant 0 : i32
    %c0_i32_0 = arith.constant 0 : i32
    %c0_i32_1 = arith.constant 0 : i32
    return %c0_i32, %c0_i32_0 : i32, i32
  }
  func.func @transform_5(%arg0: i32) -> (i32, i32, i32) {
    %c0_i32 = arith.constant 0 : i32
    %c0_i32_0 = arith.constant 0 : i32
    %c0_i32_1 = arith.constant 0 : i32
    %c0_i32_2 = arith.constant 0 : i32
    return %c0_i32, %c0_i32_0, %c0_i32_1 : i32, i32, i32
  }
  func.func @transform_6(%arg0: i32) -> (i32, i32) {
    %c0_i32 = arith.constant 0 : i32
    %c0_i32_0 = arith.constant 0 : i32
    %c0_i32_1 = arith.constant 0 : i32
    return %c0_i32, %c0_i32_0 : i32, i32
  }
  func.func @transform_7(%arg0: i32) -> (i32, i32, i32) {
    %c0_i32 = arith.constant 0 : i32
    %c0_i32_0 = arith.constant 0 : i32
    %c0_i32_1 = arith.constant 0 : i32
    return %arg0, %c0_i32, %c0_i32_0 : i32, i32, i32
  }
}

</mosaic_0001>

<bundles_post_ra>
// kernel: spp_pallas.1
= control target key start
LH: loop header
LB: loop body
LE: loop exit
PB: predicated region body
PF: predicated region fallthrough
CT: control target
= control target key end

     0   :  { %s1003_s24 = smov 0   ;;  %s1317_s0 = inlined_call_operand.vmem [shape: f32[2,4,256], index: 0, kind: input, shape index: {}]   ;;  %s1318_s1 = inlined_call_operand.vmem [shape: s32[1,256], index: 1, kind: input, shape index: {}]   ;;  %s1319_s2 = inlined_call_operand.vmem [shape: s32[1,256], index: 2, kind: input, shape index: {}]   ;;  %s1320_s3 = inlined_call_operand.vmem [shape: f32[8,4], index: 3, kind: input, shape index: {}]   ;;  %s1321_s4 = inlined_call_operand.vmem [shape: f32[8,1], index: 4, kind: input, shape index: {}]   ;;  %s1322_s5 = inlined_call_operand.vmem [shape: f32[4,8,8], index: 5, kind: input, shape index: {}]   ;;  %s1323_s6 = inlined_call_operand.vmem [shape: f32[8,1], index: 6, kind: input, shape index: {}]   ;;  %s1324_s7 = inlined_call_operand.vmem [shape: f32[2,8,256], index: 7, kind: output, shape index: {}]  }
   0x1 LB: > { %s897_s25 = sadd.s32 4294967295, %s951_s24   ;;  %p901_p0 = scmp.ge.s32.totalorder %s951_s24, 1  ;;  %s951_s24 = sphi %s1003_s24, %s17_s24  }
   0x2   : > { %p237_p1 = scmp.lt.s32.totalorder %s951_s24, 3 }
   0x4   : > { %p238_p2 = pnand %p901_p0, %p237_p1 }
   0x5   : > { %p269_p3 = scmp.lt.s32.totalorder (!%p238_p2), %s897_s25, 1  ;;  %s954_s11 = smov (!%p238_p2), 1  }
   0x6   : > { %241 = sbr.rel (%p238_p2) target bundleno = 1117 (0x45d), region = 48  ;;  %s955_s12 = smov (!%p238_p2), 127  }
   0x7   : > { %s956_s13 = smov (!%p238_p2), 126   ;;  %s957_s14 = smov (!%p238_p2), 2  }
   0x8   : > { %s959_s17 = smov (!%p238_p2), 112   ;;  %s960_s18 = smov (!%p238_p2), 16  }
   0x9   : > { %s961_s19 = smov (!%p238_p2), 96   ;;  %s962_s20 = smov (!%p238_p2), 32  }
   0xb   : > { %v299_v0 = vld [vmem:[%s1321_s4] sm:$0xff]  ;;  %v953_v1 = vmov 0   ;;  %s1326_s25 = smov (!%p269_p3, %s897_s25), 1  ;;  %vm313_vm0 = vcmask 1043456   ;;  %vm309_vm1 = vcmask 31744   ;;  %v363_v13 = vlaneseq }
   0xc   : > { %943 = vset.pattern.permute.xlu0 %v953_v1  ;;  %944 = vset.pattern.permute.xlu1 %v953_v1  ;;  %s923_s28 = sshll.u32 %s1326_s25, 3  ;;  %v298_v3 = vld [vmem:[%s1320_s3] sm:$0xff]  ;;  %v958_v17 = vmov -inf  }
   0xd   : > { %302 = vperm.xlu0 %943, %v299_v0   ;;  %s273_s8 = scalar_lea.vmem %s1317_s0, %s923_s28  ;;  %v279_v14 = vld [vmem:[%s1318_s1] sm:$0x3]  ;;  %v1048_v16 = vand.u32 127, %v363_v13 }
   0xe   : > { %v297_v2 = vld [vmem:[%s273_s8] sm:$0xff]  ;;  %vm283_vm2 = vcmp.ge.s32.totalorder %v279_v14, 1  ;;  %vm281_vm3 = vcmp.lt.s32.totalorder %v279_v14, 15  ;;  %vm285_vm5 = vcmp.lt.s32.totalorder %v279_v14, 14  ;;  %vm287_vm7 = vcmp.ge.s32.totalorder %v279_v14, 2 }
   0xf   : > { %306 = vst [vmem:[#allocation1] ss:$2 sm:$0xff] %v297_v2  ;;  %v284_v18 = vsel %vm283_vm2, 0.0, %v958_v17  ;;  %vm379_vm4 = vcmp.lt.s32.totalorder %v1048_v16, 1  ;;  %v282_v20 = vsel %vm281_vm3, 0.0, %v958_v17  ;;  %vm365_vm6 = vcmp.lt.s32.totalorder %v1048_v16, 127 }
  0x10   : > { %v1054_v21 = vperm.slane %v284_v18, 0  ;;  %v1056_v22 = vperm.slane %v284_v18, 1  ;;  %v1062_v26 = vperm.slane %v282_v20, 0  ;;  %v1064_v27 = vperm.slane %v282_v20, 1  ;;  %v280_v61 = vld [vmem:[%s1319_s2] sm:$0x3] }
  0x11   : > { %v286_v28 = vsel %vm285_vm5, 0.0, %v958_v17  ;;  %v288_v31 = vsel %vm287_vm7, 0.0, %v958_v17  ;;  %vm397_vm8 = vcmp.lt.s32.totalorder %v1048_v16, 126  ;;  %vm411_vm9 = vcmp.lt.s32.totalorder %v1048_v16, 2 }
  0x12   : > { %v1075_v35 = vperm.slane %v286_v28, 0  ;;  %v1077_v36 = vperm.slane %v286_v28, 1  ;;  %v1082_v39 = vperm.slane %v288_v31, 0  ;;  %v1084_v40 = vperm.slane %v288_v31, 1 }
  0x13   : > { %vm291_vm10 = vcmp.ge.s32.totalorder %v280_v61, 1  ;;  %vm289_vm11 = vcmp.lt.s32.totalorder %v280_v61, 15  ;;  %vm443_vm12 = vcmp.lt.s32.totalorder %v1048_v16, 16  ;;  %vm293_vm13 = vcmp.lt.s32.totalorder %v280_v61, 14 }
  0x14   : > { %v292_v63 = vsel %vm291_vm10, 0.0, %v958_v17  ;;  %v290_v0 = vsel %vm289_vm11, 0.0, %v958_v17  ;;  %vm429_vm14 = vcmp.lt.s32.totalorder %v1048_v16, 112  ;;  %vm295_vm15 = vcmp.ge.s32.totalorder %v280_v61, 2 }
  0x15   : > { %v1115_v2 = vperm.slane %v292_v63, 0  ;;  %vm491_vm2 = vcmask 64512  }
  0x16   : > { %v307_v4 = vld.sshfl [vmem:[#allocation1] sm:$0xff pattern:$0x75316420]  ;;  %v308_v5 = vld.sshfl [vmem:[#allocation1 + $0x8] sm:$0xff pattern:$0x75316420] }
  0x17   : > { %906 = vmatpush.msk.msra.mxu0 %vm313_vm0, %v307_v4  ;;  %908 = vmatpush.msk.msra.mxu1 %vm313_vm0, %v308_v5  ;;  %vm461_vm0 = vcmp.lt.s32.totalorder %v1048_v16, 96 }
  0x18   : > { %907 = vmatmul.msk.f32.vlgmr.msra.gmra.mxu0 %vm309_vm1, %v298_v3  ;;  %909 = vmatmul.msk.f32.vlgmr.msra.gmra.mxu1 %vm309_vm1, %v298_v3  ;;  %v1117_v3 = vperm.slane %v292_v63, 1  ;;  %vm475_vm1 = vcmp.lt.s32.totalorder %v1048_v16, 32  ;;  %v918_v16 = vld [vmem:[%s1322_s5 + $0x18] sm:$0xff] }
  0x7f   : > { %v303_v6 = vpop.permute.xlu0 %302 }
  0x95   : > { %v335_v7 = vpop.f32.mrf.mxu0  ;;  %v355_v8 = vpop.f32.mrf.mxu1 }
  0x96   : > { %v1023_v9 = vadd.f32 %v335_v7, %v303_v6  ;;  %v1025_v10 = vadd.f32 %v355_v8, %v303_v6  ;;  %v1123_v7 = vperm.slane %v290_v0, 0  ;;  %v1125_v8 = vperm.slane %v290_v0, 1 }
  0x98   : > { %377 = vrot.lane.b32.xlu2 %v1025_v10, %s954_s11  ;;  %361 = vrot.lane.b32.xlu1 %v1025_v10, %s955_s12 }
  0x99   : > { %573 = vmatpush.msrb.mxu1 %v1025_v10  ;;  %359 = vrot.lane.b32.xlu0 %v1023_v9, %s955_s12 }
  0x9a   : > { %553 = vmatpush.msrb.mxu0 %v1023_v9 }
  0xa0   : > { %393 = vrot.lane.b32.xlu2 %v1023_v9, %s956_s13  ;;  %375 = vrot.lane.b32.xlu1 %v1023_v9, %s954_s11 }
  0xa1   : > { %395 = vrot.lane.b32.xlu0 %v1025_v10, %s956_s13 }
  0xa8   : > { %409 = vrot.lane.b32.xlu2 %v1025_v10, %s957_s14  ;;  %407 = vrot.lane.b32.xlu1 %v1023_v9, %s957_s14 }
  0xf2   : > { %v378_v11 = vpop.permute.xlu2 %377 }
  0xfa   : > { %v394_v19 = vpop.permute.xlu2 %393 }
 0x102   : > { %v410_v43 = vpop.permute.xlu2 %409 }
 0x10a   : > { %v362_v12 = vpop.permute.xlu1 %361 }
 0x10b   : > { %v360_v15 = vpop.permute.xlu0 %359 }
 0x10c   : > { %v366_v29 = vsel %vm365_vm6, %v360_v15, %v362_v12  ;;  %v367_v30 = vsel %vm365_vm6, %v362_v12, %v360_v15  ;;  %v296_v12 = vsel %vm295_vm15, 0.0, %v958_v17 }
 0x10d   : > { %v373_v37 = vadd.f32 %v1062_v26, %v366_v29  ;;  %v374_v38 = vadd.f32 %v1064_v27, %v367_v30 }
 0x112   : > { %v376_v23 = vpop.permute.xlu1 %375 }
 0x113   : > { %v380_v24 = vsel %vm379_vm4, %v376_v23, %v378_v11  ;;  %v381_v25 = vsel %vm379_vm4, %v378_v11, %v376_v23  ;;  %v396_v34 = vpop.permute.xlu0 %395 }
 0x114   : > { %v387_v32 = vadd.f32 %v1054_v21, %v381_v25  ;;  %v388_v33 = vadd.f32 %v1056_v22, %v380_v24  ;;  %v398_v41 = vsel %vm397_vm8, %v394_v19, %v396_v34  ;;  %v399_v42 = vsel %vm397_vm8, %v396_v34, %v394_v19 }
 0x115   : > { %v405_v49 = vadd.f32 %v1075_v35, %v398_v41  ;;  %v406_v50 = vadd.f32 %v1077_v36, %v399_v42  ;;  %v1143_v24 = vperm.slane %v296_v12, 0 }
 0x116   : > { %v389_v44 = vmax.f32 %v373_v37, %v387_v32  ;;  %v390_v45 = vmax.f32 %v374_v38, %v388_v33 }
 0x118   : > { %v391_v53 = vmax.f32 %v1023_v9, %v389_v44  ;;  %v392_v54 = vmax.f32 %v1025_v10, %v390_v45  ;;  %v294_v9 = vsel %vm293_vm13, 0.0, %v958_v17  ;;  %v1145_v17 = vperm.slane %v296_v12, 1 }
 0x119   : > { %v1136_v15 = vperm.slane %v294_v9, 0  ;;  %v1138_v18 = vperm.slane %v294_v9, 1 }
 0x11a   : > { %v408_v46 = vpop.permute.xlu1 %407 }
 0x11b   : > { %v412_v47 = vsel %vm411_vm9, %v408_v46, %v410_v43  ;;  %v413_v48 = vsel %vm411_vm9, %v410_v43, %v408_v46 }
 0x11c   : > { %v419_v51 = vadd.f32 %v1082_v39, %v413_v48  ;;  %v420_v52 = vadd.f32 %v1084_v40, %v412_v47 }
 0x11e   : > { %v421_v55 = vmax.f32 %v405_v49, %v419_v51  ;;  %v422_v56 = vmax.f32 %v406_v50, %v420_v52 }
 0x120   : > { %v423_v57 = vmax.f32 %v391_v53, %v421_v55  ;;  %v424_v58 = vmax.f32 %v392_v54, %v422_v56 }
 0x122   : > { %427 = vrot.lane.b32.xlu1 %v424_v58, %s959_s17  ;;  %439 = vrot.lane.b32.xlu2 %v423_v57, %s960_s18 }
 0x123   : > { %425 = vrot.lane.b32.xlu0 %v423_v57, %s959_s17 }
 0x12a   : > { %457 = vrot.lane.b32.xlu1 %v423_v57, %s961_s19  ;;  %459 = vrot.lane.b32.xlu2 %v424_v58, %s961_s19 }
 0x12b   : > { %441 = vrot.lane.b32.xlu0 %v424_v58, %s960_s18 }
 0x132   : > { %473 = vrot.lane.b32.xlu1 %v424_v58, %s962_s20 }
 0x133   : > { %471 = vrot.lane.b32.xlu0 %v423_v57, %s962_s20 }
 0x17c   : > { %v440_v62 = vpop.permute.xlu2 %439 }
 0x184   : > { %v460_v19 = vpop.permute.xlu2 %459 }
 0x194   : > { %v428_v59 = vpop.permute.xlu1 %427 }
 0x195   : > { %v426_v60 = vpop.permute.xlu0 %425 }
 0x196   : > { %v430_v10 = vsel %vm429_vm14, %v426_v60, %v428_v59  ;;  %v431_v11 = vsel %vm429_vm14, %v428_v59, %v426_v60 }
 0x197   : > { %v437_v20 = vadd.f32 %v1123_v7, %v430_v10  ;;  %v438_v23 = vadd.f32 %v1125_v8, %v431_v11 }
 0x19c   : > { %v458_v1 = vpop.permute.xlu1 %457 }
 0x19d   : > { %v442_v4 = vpop.permute.xlu0 %441  ;;  %v462_v25 = vsel %vm461_vm0, %v458_v1, %v460_v19  ;;  %v463_v28 = vsel %vm461_vm0, %v460_v19, %v458_v1 }
 0x19e   : > { %v444_v5 = vsel %vm443_vm12, %v440_v62, %v442_v4  ;;  %v445_v6 = vsel %vm443_vm12, %v442_v4, %v440_v62  ;;  %v469_v37 = vadd.f32 %v1136_v15, %v462_v25  ;;  %v470_v38 = vadd.f32 %v1138_v18, %v463_v28 }
 0x19f   : > { %v451_v13 = vadd.f32 %v1115_v2, %v445_v6  ;;  %v452_v14 = vadd.f32 %v1117_v3, %v444_v5 }
 0x1a1   : > { %v453_v30 = vmax.f32 %v437_v20, %v451_v13  ;;  %v454_v31 = vmax.f32 %v438_v23, %v452_v14 }
 0x1a3   : > { %v455_v43 = vmax.f32 %v423_v57, %v453_v30  ;;  %v456_v44 = vmax.f32 %v424_v58, %v454_v31 }
 0x1a4   : > { %v474_v29 = vpop.permute.xlu1 %473 }
 0x1a5   : > { %v472_v32 = vpop.permute.xlu0 %471 }
 0x1a6   : > { %v476_v33 = vsel %vm475_vm1, %v472_v32, %v474_v29  ;;  %v477_v34 = vsel %vm475_vm1, %v474_v29, %v472_v32 }
 0x1a7   : > { %v483_v41 = vadd.f32 %v1143_v24, %v477_v34  ;;  %v484_v42 = vadd.f32 %v1145_v17, %v476_v33 }
 0x1a9   : > { %v485_v45 = vmax.f32 %v469_v37, %v483_v41  ;;  %v486_v46 = vmax.f32 %v470_v38, %v484_v42 }
 0x1ab   : > { %v487_v47 = vmax.f32 %v455_v43, %v485_v45  ;;  %v488_v48 = vmax.f32 %v456_v44, %v486_v46 }
 0x1ad   : > { %586 = vrot.lane.b32.xlu1 %v487_v47, %s954_s11  ;;  %578 = vrot.lane.b32.xlu2 %v487_v47, %s955_s12 }
 0x1ae   : > { %510 = vmatpush.msra.mxu2 %v487_v47  ;;  %580 = vrot.lane.b32.xlu0 %v488_v48, %s955_s12 }
 0x1af   : > { %530 = vmatpush.msra.mxu3 %v488_v48 }
 0x1b5   : > { %600 = vrot.lane.b32.xlu1 %v488_v48, %s956_s13  ;;  %588 = vrot.lane.b32.xlu2 %v488_v48, %s954_s11 }
 0x1b6   : > { %598 = vrot.lane.b32.xlu0 %v487_v47, %s956_s13 }
 0x1bd   : > { %606 = vrot.lane.b32.xlu2 %v487_v47, %s957_s14 }
 0x1be   : > { %608 = vrot.lane.b32.xlu0 %v488_v48, %s957_s14 }
 0x207   : > { %v579_v49 = vpop.permute.xlu2 %578 }
 0x20f   : > { %v589_v52 = vpop.permute.xlu2 %588 }
 0x217   : > { %v607_v1 = vpop.permute.xlu2 %606 }
 0x21f   : > { %v587_v51 = vpop.permute.xlu1 %586 }
 0x220   : > { %v581_v50 = vpop.permute.xlu0 %580  ;;  %v590_v54 = vsel %vm379_vm4, %v587_v51, %v589_v52  ;;  %v591_v55 = vsel %vm379_vm4, %v589_v52, %v587_v51 }
 0x221   : > { %v582_v56 = vsel %vm365_vm6, %v579_v49, %v581_v50  ;;  %v583_v57 = vsel %vm365_vm6, %v581_v50, %v579_v49  ;;  %v592_v58 = vadd.f32 %v591_v55, %v1054_v21  ;;  %v593_v59 = vadd.f32 %v590_v54, %v1056_v22 }
 0x222   : > { %v584_v60 = vadd.f32 %v582_v56, %v1062_v26  ;;  %v585_v61 = vadd.f32 %v583_v57, %v1064_v27 }
 0x224   : > { %v594_v4 = vmax.f32 %v584_v60, %v592_v58  ;;  %v595_v5 = vmax.f32 %v585_v61, %v593_v59 }
 0x226   : > { %v596_v19 = vmax.f32 %v487_v47, %v594_v4  ;;  %v597_v20 = vmax.f32 %v488_v48, %v595_v5 }
 0x227   : > { %v601_v62 = vpop.permute.xlu1 %600 }
 0x228   : > { %v599_v53 = vpop.permute.xlu0 %598 }
 0x229   : > { %v602_v63 = vsel %vm397_vm8, %v599_v53, %v601_v62  ;;  %v603_v0 = vsel %vm397_vm8, %v601_v62, %v599_v53 }
 0x22a   : > { %v604_v11 = vadd.f32 %v602_v63, %v1075_v35  ;;  %v605_v12 = vadd.f32 %v603_v0, %v1077_v36 }
 0x230   : > { %v609_v6 = vpop.permute.xlu0 %608 }
 0x231   : > { %v610_v9 = vsel %vm411_vm9, %v607_v1, %v609_v6  ;;  %v611_v10 = vsel %vm411_vm9, %v609_v6, %v607_v1 }
 0x232   : > { %v612_v13 = vadd.f32 %v611_v10, %v1082_v39  ;;  %v613_v14 = vadd.f32 %v610_v9, %v1084_v40 }
 0x234   : > { %v614_v23 = vmax.f32 %v604_v11, %v612_v13  ;;  %v615_v25 = vmax.f32 %v605_v12, %v613_v14 }
 0x236   : > { %v616_v28 = vmax.f32 %v596_v19, %v614_v23  ;;  %v617_v29 = vmax.f32 %v597_v20, %v615_v25 }
 0x238   : > { %626 = vrot.lane.b32.xlu0 %v616_v28, %s960_s18  ;;  %618 = vrot.lane.b32.xlu1 %v616_v28, %s959_s17 }
 0x239   : > { %620 = vrot.lane.b32.xlu2 %v617_v29, %s959_s17 }
 0x240   : > { %640 = vrot.lane.b32.xlu0 %v617_v29, %s961_s19  ;;  %628 = vrot.lane.b32.xlu1 %v617_v29, %s960_s18 }
 0x241   : > { %638 = vrot.lane.b32.xlu2 %v616_v28, %s961_s19 }
 0x248   : > { %646 = vrot.lane.b32.xlu1 %v616_v28, %s962_s20 }
 0x249   : > { %648 = vrot.lane.b32.xlu2 %v617_v29, %s962_s20 }
 0x293   : > { %v621_v30 = vpop.permute.xlu2 %620 }
 0x29b   : > { %v639_v33 = vpop.permute.xlu2 %638 }
 0x2a3   : > { %v649_v50 = vpop.permute.xlu2 %648 }
 0x2aa   : > { %v619_v31 = vpop.permute.xlu1 %618  ;;  %v627_v32 = vpop.permute.xlu0 %626 }
 0x2ab   : > { %v622_v41 = vsel %vm429_vm14, %v619_v31, %v621_v30  ;;  %v623_v42 = vsel %vm429_vm14, %v621_v30, %v619_v31 }
 0x2ac   : > { %v624_v46 = vadd.f32 %v622_v41, %v1123_v7  ;;  %v625_v47 = vadd.f32 %v623_v42, %v1125_v8 }
 0x2b2   : > { %v629_v34 = vpop.permute.xlu1 %628  ;;  %v641_v43 = vpop.permute.xlu0 %640 }
 0x2b3   : > { %v630_v37 = vsel %vm443_vm12, %v627_v32, %v629_v34  ;;  %v631_v38 = vsel %vm443_vm12, %v629_v34, %v627_v32  ;;  %v642_v48 = vsel %vm461_vm0, %v639_v33, %v641_v43  ;;  %v643_v49 = vsel %vm461_vm0, %v641_v43, %v639_v33 }
 0x2b4   : > { %v632_v44 = vadd.f32 %v631_v38, %v1115_v2  ;;  %v633_v45 = vadd.f32 %v630_v37, %v1117_v3  ;;  %v644_v56 = vadd.f32 %v642_v48, %v1136_v15  ;;  %v645_v57 = vadd.f32 %v643_v49, %v1138_v18 }
 0x2b6   : > { %v634_v51 = vmax.f32 %v624_v46, %v632_v44  ;;  %v635_v52 = vmax.f32 %v625_v47, %v633_v45 }
 0x2b8   : > { %v636_v60 = vmax.f32 %v616_v28, %v634_v51  ;;  %v637_v61 = vmax.f32 %v617_v29, %v635_v52 }
 0x2ba   : > { %v647_v53 = vpop.permute.xlu1 %646 }
 0x2bb   : > { %v650_v54 = vsel %vm475_vm1, %v647_v53, %v649_v50  ;;  %v651_v55 = vsel %vm475_vm1, %v649_v50, %v647_v53 }
 0x2bc   : > { %v652_v58 = vadd.f32 %v651_v55, %v1143_v24  ;;  %v653_v59 = vadd.f32 %v650_v54, %v1145_v17 }
 0x2be   : > { %v654_v62 = vmax.f32 %v644_v56, %v652_v58  ;;  %v655_v63 = vmax.f32 %v645_v57, %v653_v59 }
 0x2c0   : > { %v656_v0 = vmax.f32 %v636_v60, %v654_v62  ;;  %v657_v1 = vmax.f32 %v637_v61, %v655_v63 }
 0x2c2   : > { %713 = vrot.lane.b32.xlu2 %v656_v0, %s954_s11  ;;  %705 = vrot.lane.b32.xlu0 %v656_v0, %s955_s12 }
 0x2c3   : > { %678 = vmatpush.msrb.mxu2 %v656_v0  ;;  %707 = vrot.lane.b32.xlu1 %v657_v1, %s955_s12  ;;  %s924_s12 = sshll.u32 %s1326_s25, 4 }
 0x2c4   : > { %698 = vmatpush.msrb.mxu3 %v657_v1  ;;  %s278_s15 = scalar_lea.vmem %s1324_s7, %s924_s12 }
 0x2ca   : > { %727 = vrot.lane.b32.xlu2 %v657_v1, %s956_s13  ;;  %715 = vrot.lane.b32.xlu0 %v657_v1, %s954_s11 }
 0x2cb   : > { %725 = vrot.lane.b32.xlu1 %v656_v0, %s956_s13 }
 0x2d2   : > { %733 = vrot.lane.b32.xlu0 %v656_v0, %s957_s14 }
 0x2d3   : > { %735 = vrot.lane.b32.xlu1 %v657_v1, %s957_s14 }
 0x31c   : > { %v714_v6 = vpop.permute.xlu2 %713 }
 0x324   : > { %v728_v23 = vpop.permute.xlu2 %727 }
 0x334   : > { %v706_v4 = vpop.permute.xlu0 %705 }
 0x335   : > { %v708_v5 = vpop.permute.xlu1 %707 }
 0x336   : > { %v709_v13 = vsel %vm365_vm6, %v706_v4, %v708_v5  ;;  %v710_v14 = vsel %vm365_vm6, %v708_v5, %v706_v4 }
 0x337   : > { %v711_v25 = vadd.f32 %v709_v13, %v1062_v26  ;;  %v712_v28 = vadd.f32 %v710_v14, %v1064_v27 }
 0x33c   : > { %v716_v9 = vpop.permute.xlu0 %715 }
 0x33d   : > { %v726_v10 = vpop.permute.xlu1 %725  ;;  %v717_v11 = vsel %vm379_vm4, %v714_v6, %v716_v9  ;;  %v718_v12 = vsel %vm379_vm4, %v716_v9, %v714_v6 }
 0x33e   : > { %v719_v19 = vadd.f32 %v718_v12, %v1054_v21  ;;  %v720_v20 = vadd.f32 %v717_v11, %v1056_v22  ;;  %v729_v29 = vsel %vm397_vm8, %v726_v10, %v728_v23  ;;  %v730_v30 = vsel %vm397_vm8, %v728_v23, %v726_v10 }
 0x33f   : > { %v731_v26 = vadd.f32 %v729_v29, %v1075_v35  ;;  %v732_v27 = vadd.f32 %v730_v30, %v1077_v36  ;;  %v910_v35 = vld [vmem:[%s1322_s5 + $0x8] sm:$0xff]  ;;  %v915_v36 = vld [vmem:[%s1322_s5 + $0x10] sm:$0xff] }
 0x340   : > { %v721_v32 = vmax.f32 %v711_v25, %v719_v19  ;;  %v722_v33 = vmax.f32 %v712_v28, %v720_v20  ;;  %911 = vmatmul.msk.f32.vlgmr.msra.gmra.mxu2 %vm491_vm2, %v910_v35  ;;  %912 = vmatmul.msk.f32.vlgmr.msra.gmra.mxu3 %vm491_vm2, %v910_v35 }
 0x342   : > { %v723_v41 = vmax.f32 %v656_v0, %v721_v32  ;;  %v724_v42 = vmax.f32 %v657_v1, %v722_v33 }
 0x344   : > { %v734_v31 = vpop.permute.xlu0 %733 }
 0x345   : > { %v736_v34 = vpop.permute.xlu1 %735 }
 0x346   : > { %v737_v21 = vsel %vm411_vm9, %v734_v31, %v736_v34  ;;  %v738_v22 = vsel %vm411_vm9, %v736_v34, %v734_v31 }
 0x347   : > { %v739_v37 = vadd.f32 %v738_v22, %v1082_v39  ;;  %v740_v38 = vadd.f32 %v737_v21, %v1084_v40  ;;  %v358_v39 = vld [vmem:[%s1322_s5] sm:$0xff] }
 0x348   : > { %916 = vmatmul.msk.f32.vlgmr.msrb.gmra.mxu2 %vm491_vm2, %v915_v36  ;;  %917 = vmatmul.msk.f32.vlgmr.msrb.gmra.mxu3 %vm491_vm2, %v915_v36  ;;  %v832_v40 = vld [vmem:[%s1323_s6] sm:$0xff] }
 0x349   : > { %v741_v43 = vmax.f32 %v731_v26, %v739_v37  ;;  %v742_v44 = vmax.f32 %v732_v27, %v740_v38  ;;  %913 = vmatmul.msk.f32.vlgmr.msrb.gmra.mxu0 %vm491_vm2, %v358_v39  ;;  %914 = vmatmul.msk.f32.vlgmr.msrb.gmra.mxu1 %vm491_vm2, %v358_v39 }
 0x34b   : > { %v743_v45 = vmax.f32 %v723_v41, %v741_v43  ;;  %v744_v46 = vmax.f32 %v724_v42, %v742_v44 }
 0x34d   : > { %753 = vrot.lane.b32.xlu1 %v743_v45, %s960_s18  ;;  %745 = vrot.lane.b32.xlu2 %v743_v45, %s959_s17 }
 0x34e   : > { %747 = vrot.lane.b32.xlu0 %v744_v46, %s959_s17 }
 0x355   : > { %767 = vrot.lane.b32.xlu1 %v744_v46, %s961_s19  ;;  %755 = vrot.lane.b32.xlu2 %v744_v46, %s960_s18 }
 0x356   : > { %765 = vrot.lane.b32.xlu0 %v743_v45, %s961_s19 }
 0x35d   : > { %773 = vrot.lane.b32.xlu2 %v743_v45, %s962_s20  ;;  %835 = vperm.xlu1 %944, %v832_v40  }
 0x35e   : > { %775 = vrot.lane.b32.xlu0 %v744_v46, %s962_s20 }
 0x3a7   : > { %v746_v47 = vpop.permute.xlu2 %745 }
 0x3af   : > { %v756_v50 = vpop.permute.xlu2 %755 }
 0x3b7   : > { %v774_v63 = vpop.permute.xlu2 %773 }
 0x3bf   : > { %v754_v49 = vpop.permute.xlu1 %753 }
 0x3c0   : > { %v748_v48 = vpop.permute.xlu0 %747  ;;  %v757_v52 = vsel %vm443_vm12, %v754_v49, %v756_v50  ;;  %v758_v53 = vsel %vm443_vm12, %v756_v50, %v754_v49 }
 0x3c1   : > { %v749_v54 = vsel %vm429_vm14, %v746_v47, %v748_v48  ;;  %v750_v55 = vsel %vm429_vm14, %v748_v48, %v746_v47  ;;  %v759_v56 = vadd.f32 %v758_v53, %v1115_v2  ;;  %v760_v57 = vadd.f32 %v757_v52, %v1117_v3 }
 0x3c2   : > { %v751_v58 = vadd.f32 %v749_v54, %v1123_v7  ;;  %v752_v59 = vadd.f32 %v750_v55, %v1125_v8 }
 0x3c4   : > { %v761_v0 = vmax.f32 %v751_v58, %v759_v56  ;;  %v762_v1 = vmax.f32 %v752_v59, %v760_v57 }
 0x3c6   : > { %v763_v9 = vmax.f32 %v743_v45, %v761_v0  ;;  %v764_v10 = vmax.f32 %v744_v46, %v762_v1 }
 0x3c7   : > { %v768_v60 = vpop.permute.xlu1 %767 }
 0x3c8   : > { %v766_v51 = vpop.permute.xlu0 %765 }
 0x3c9   : > { %v769_v61 = vsel %vm461_vm0, %v766_v51, %v768_v60  ;;  %v770_v62 = vsel %vm461_vm0, %v768_v60, %v766_v51 }
 0x3ca   : > { %v771_v7 = vadd.f32 %v769_v61, %v1136_v15  ;;  %v772_v8 = vadd.f32 %v770_v62, %v1138_v18  ;;  %v512_v15 = vpop.f32.mrf.mxu2  ;;  %v532_v18 = vpop.f32.mrf.mxu3 }
 0x3cf   : > { %v836_v30 = vpop.permute.xlu1 %835 }
 0x3d0   : > { %v776_v4 = vpop.permute.xlu0 %775 }
 0x3d1   : > { %v777_v2 = vsel %vm475_vm1, %v774_v63, %v776_v4  ;;  %v778_v3 = vsel %vm475_vm1, %v776_v4, %v774_v63 }
 0x3d2   : > { %v779_v5 = vadd.f32 %v778_v3, %v1143_v24  ;;  %v780_v6 = vadd.f32 %v777_v2, %v1145_v17  ;;  %v555_v24 = vpop.f32.mrf.mxu0  ;;  %v575_v17 = vpop.f32.mrf.mxu1 }
 0x3d3   : > { %v556_v19 = vadd.f32 %v555_v24, %v512_v15  ;;  %v576_v20 = vadd.f32 %v575_v17, %v532_v18  ;;  %v680_v23 = vpop.f32.mrf.mxu2  ;;  %v700_v25 = vpop.f32.mrf.mxu3 }
 0x3d4   : > { %v781_v11 = vmax.f32 %v771_v7, %v779_v5  ;;  %v782_v12 = vmax.f32 %v772_v8, %v780_v6 }
 0x3d5   : > { %v703_v28 = vadd.f32 %v680_v23, %v556_v19  ;;  %v704_v29 = vadd.f32 %v700_v25, %v576_v20 }
 0x3d6   : > { %v783_v13 = vmax.f32 %v763_v9, %v781_v11  ;;  %v784_v14 = vmax.f32 %v764_v10, %v782_v12 }
 0x3d8   : > { %805 = vmatpush.msra.mxu0 %v783_v13  ;;  %825 = vmatpush.msra.mxu1 %v784_v14 }
 0x3d9   : > { %919 = vmatmul.msk.f32.vlgmr.msra.gmra.mxu0 %vm491_vm2, %v918_v16  ;;  %920 = vmatmul.msk.f32.vlgmr.msra.gmra.mxu1 %vm491_vm2, %v918_v16 }
 0x456   : > { %v807_v31 = vpop.f32.mrf.mxu0  ;;  %v827_v32 = vpop.f32.mrf.mxu1 }
 0x457   : > { %v830_v33 = vadd.f32 %v807_v31, %v703_v28  ;;  %v831_v34 = vadd.f32 %v827_v32, %v704_v29 }
 0x459   : > { %v838_v21 = vadd.f32 %v836_v30, %v830_v33  ;;  %v839_v22 = vadd.f32 %v836_v30, %v831_v34 }
 0x45b   : > { %840 = vst [vmem:[%s278_s15] sm:$0xff] %v838_v21 }
 0x45c   : > { %841 = vst [vmem:[%s278_s15 + $0x8] sm:$0xff] %v839_v22 }
 0x45d PF: > { %s17_s24 = sadd.s32 1, %s951_s24  }
 0x45e   : > { %p14_p4 = scmp.ge.s32.totalorder %s17_s24, 4  }
 0x460   :  { %16 = sbr.rel (!%p14_p4) target bundleno = 1 (0x1), region = 81 }

</bundles_post_ra>
